<compile_context>
chip_gen: v6e
topology: v6e:2x2x1
jax: 0.10.0
libtpu: 0.0.40
codegen_flags: <defaults>
</compile_context>

<pallas_src>
import jax
import jax.numpy as jnp
from jax.experimental import pallas as pl
from jax.experimental.pallas import tpu as pltpu


INPUT_SIZE = 40
HALF_IN = INPUT_SIZE // 2   # 20
HIDDEN = 64                 # per-branch hidden size
FUSED = 2 * HIDDEN          # 128 = exactly one f32 vreg lane width
OUT = 1
MAX_B_BLK = 32              # batch rows per grid block (vreg-pressure cap)


def _dh_sfnn_kernel(
    x_ref,      # (1, t_blk*b_blk, 40)  fused branch inputs, row = t*b_blk + b
    w_ref,      # (40, 128)  block-diagonal [[w1*s1, 0], [0, w2*s2]]
    p_ref,      # (8, 128)   rows: 0=beta, 1=alpha, 2=wo|wo, 3=folded bias
    bo_ref,     # (1, 1)
    out_ref,    # (b_blk, t_blk)  sigmoid readout, time on the lane axis
    cur_sc,     # VMEM (t_blk*b_blk, 128)  hoisted, pre-scaled input currents
    d_sc,       # VMEM (b_blk, 128)  fused dendritic state (persists over grid)
    m_sc,       # VMEM (b_blk, 128)  fused membrane state (persists over grid)
):
    t_block = pl.program_id(1)

    @pl.when(t_block == 0)
    def _():
        d_sc[...] = jnp.zeros_like(d_sc)
        m_sc[...] = jnp.zeros_like(m_sc)

    tb2 = cur_sc.shape[0]        # t_blk * b_blk (static)
    b_blk = d_sc.shape[0]        # static
    t_blk = tb2 // b_blk         # static

    # ---- Hoisted feed-forward projection: ONE MXU matmul per block. --------
    # (1-alpha)(1-beta) is already folded into w_ref and the bias row, so the
    # recurrence below needs no per-step (1-gate) multiplies.
    cur_sc[...] = (
        jnp.dot(x_ref[0], w_ref[...], preferred_element_type=jnp.float32)
        + p_ref[3:4, :]
    )

    # Hoist sublane broadcasts out of the loop (JAX does not CSE them).
    beta = jnp.broadcast_to(p_ref[0:1, :], (b_blk, FUSED))
    alpha = jnp.broadcast_to(p_ref[1:2, :], (b_blk, FUSED))
    wo = jnp.broadcast_to(p_ref[2:3, :], (b_blk, FUSED))
    lane_t = jax.lax.broadcasted_iota(jnp.int32, (1, t_blk), 1)

    # ---- Sequential recurrence: element-wise VPU + XLU readout per step. ---
    def step(t, carry):
        d, m, acc = carry
        row = pl.multiple_of(t * b_blk, b_blk)
        cur = cur_sc[pl.ds(row, b_blk), :]        # (b_blk, 128), contiguous
        d = beta * d + cur                        # d == (1-alpha)*d_orig (exact)
        m = alpha * m + d
        s = jnp.sum(m * wo, axis=-1, keepdims=True)   # (b_blk, 1) XLU reduce
        acc = jnp.where(lane_t == t, s, acc)          # register-resident scatter
        return d, m, acc

    acc0 = jnp.zeros((b_blk, t_blk), jnp.float32)
    d_f, m_f, acc = jax.lax.fori_loop(
        0, t_blk, step, (d_sc[...], m_sc[...], acc0), unroll=min(8, t_blk)
    )
    d_sc[...] = d_f
    m_sc[...] = m_f

    # ---- Lane-dense store: (b_blk, t_blk), time on the lane axis. ----------
    out_ref[...] = jax.nn.sigmoid(acc + bo_ref[...])


def _round_up(x, m):
    return ((x + m - 1) // m) * m


def _tensorcores_per_chip():
    """2 on v7x (two TensorCores per chip); 1 on v5e/v6e (and on failure)."""
    try:
        dev = jax.devices()[0]
        if dev.platform != "tpu":
            return 1
        return 2 if "v7" in dev.device_kind.lower() else 1
    except Exception:
        return 1


def dh_sfnn_forward(x, params):
    """x: (batch, seq, 40) float32 -> (batch, seq, 1) float32."""
    B, S, F = x.shape
    assert F == INPUT_SIZE
    f32 = jnp.float32
    cores = _tensorcores_per_chip()

    # ---- batch blocking -----------------------------------------------------
    # Round to 16 on 2-core chips (v7x) so both TensorCores get work; keep the
    # whole batch on the single core for v5e/v6e (no pointless split).
    B_pad = _round_up(B, 16) if (cores == 2 and B > 8) else _round_up(B, 8)
    if cores > 1 and B_pad >= 8 * cores:
        max_bb = min(MAX_B_BLK, B_pad // cores)
    else:
        max_bb = min(MAX_B_BLK, B_pad)
    # Largest multiple of 8 that divides B_pad and fits the cap.
    b_blk = max(c for c in range(8, max_bb + 1, 8) if B_pad % c == 0)
    n_bb = B_pad // b_blk

    # ---- time blocking ------------------------------------------------------
    # t_blk = 128 keeps the output block exactly lane-wide; with b_blk <= 32
    # the per-block VMEM (x double-buffer + cur scratch ~ 3*t_blk*b_blk*512 B)
    # stays <= ~7 MiB, below every generation's scoped-VMEM default.
    t_blk = S if S <= 128 else 128
    S_pad = _round_up(S, t_blk)
    nt = S_pad // t_blk
    tb2 = t_blk * b_blk

    # ---- fused, precomputed parameters (folding (1-alpha)(1-beta)) ----------
    beta1 = jax.nn.sigmoid(params["tau_n1"].astype(f32))
    beta2 = jax.nn.sigmoid(params["tau_n2"].astype(f32))
    alpha = jax.nn.sigmoid(params["tau_m"].astype(f32))
    scale1 = (1.0 - alpha) * (1.0 - beta1)
    scale2 = (1.0 - alpha) * (1.0 - beta2)

    W = jnp.zeros((F, FUSED), f32)
    W = W.at[:HALF_IN, :HIDDEN].set(params["w1"].astype(f32) * scale1[None, :])
    W = W.at[HALF_IN:, HIDDEN:].set(params["w2"].astype(f32) * scale2[None, :])

    wo = params["wo"].astype(f32)[:, 0]
    zrow = jnp.zeros((FUSED,), f32)
    packed = jnp.stack([
        jnp.concatenate([beta1, beta2]),                       # row 0: beta
        jnp.concatenate([alpha, alpha]),                       # row 1: alpha
        jnp.concatenate([wo, wo]),                             # row 2: readout
        jnp.concatenate([params["b1"].astype(f32) * scale1,    # row 3: folded b
                         params["b2"].astype(f32) * scale2]),
        zrow, zrow, zrow, zrow,
    ])
    bo = params["bo"].astype(f32).reshape(1, 1)

    # ---- input layout: time-major rows within each batch block --------------
    # TODO(synk): for very long sequences this pad+transpose is one extra HBM
    # read+write of x; produce x upstream in this interleaved layout (or
    # reorder in-kernel) to avoid it.
    xp = jnp.pad(x.astype(f32), ((0, B_pad - B), (0, S_pad - S), (0, 0)))
    xr = xp.reshape(n_bb, b_blk, S_pad, F)
    xr = jnp.transpose(xr, (0, 2, 1, 3)).reshape(n_bb, S_pad * b_blk, F)

    # VMEM estimate: 2x double-buffered x blocks + cur scratch + states + out.
    vmem_need = 4 * (3 * tb2 * FUSED + 4 * b_blk * FUSED
                     + 2 * b_blk * max(t_blk, 128) + 64 * FUSED)
    vmem_limit = int(min(max(2 * vmem_need, 16 << 20), 48 << 20))

    out = pl.pallas_call(
        _dh_sfnn_kernel,
        out_shape=jax.ShapeDtypeStruct((B_pad, S_pad), f32),
        grid_spec=pltpu.PrefetchScalarGridSpec(
            num_scalar_prefetch=0,
            grid=(n_bb, nt),
            in_specs=[
                pl.BlockSpec((1, tb2, F), lambda j, t: (j, t, 0)),  # x block
                pl.BlockSpec((F, FUSED), lambda j, t: (0, 0)),      # folded W
                pl.BlockSpec((8, FUSED), lambda j, t: (0, 0)),      # packed params
                pl.BlockSpec((1, 1), lambda j, t: (0, 0)),          # bo
            ],
            out_specs=pl.BlockSpec((b_blk, t_blk), lambda j, t: (j, t)),
            scratch_shapes=[
                pltpu.VMEM((tb2, FUSED), f32),     # hoisted input currents
                pltpu.VMEM((b_blk, FUSED), f32),   # dendritic state
                pltpu.VMEM((b_blk, FUSED), f32),   # membrane state
            ],
        ),
        compiler_params=pltpu.CompilerParams(
            dimension_semantics=("parallel", "arbitrary"),
            vmem_limit_bytes=vmem_limit,
        ),
    )(xr, W, packed, bo)

    # (B_pad, S_pad) -> (B, S, 1), matching torch.stack(outputs, dim=1).
    return out[:B, :S][:, :, None]


def init_params(key, input_size=INPUT_SIZE, hidden_size=HIDDEN, output_size=OUT):
    """Deterministic init mirroring the module's __init__ shapes/ranges."""
    half = input_size // 2
    ks = jax.random.split(key, 9)
    lim_b = 1.0 / jnp.sqrt(half)
    lim_o = 1.0 / jnp.sqrt(hidden_size)
    return {
        # nn.Linear stores (out, in); we keep (in, out) for x @ W.
        "w1": jax.random.uniform(ks[0], (half, hidden_size), jnp.float32, -lim_b, lim_b),
        "b1": jax.random.uniform(ks[1], (hidden_size,), jnp.float32, -lim_b, lim_b),
        "w2": jax.random.uniform(ks[2], (half, hidden_size), jnp.float32, -lim_b, lim_b),
        "b2": jax.random.uniform(ks[3], (hidden_size,), jnp.float32, -lim_b, lim_b),
        "wo": jax.random.uniform(ks[4], (hidden_size, output_size), jnp.float32, -lim_o, lim_o),
        "bo": jax.random.uniform(ks[5], (output_size,), jnp.float32, -lim_o, lim_o),
        "tau_m": jax.random.uniform(ks[6], (hidden_size,), jnp.float32, 0.0, 4.0),
        # beneficial_init=True ranges
        "tau_n1": jax.random.uniform(ks[7], (hidden_size,), jnp.float32, 2.0, 6.0),
        "tau_n2": jax.random.uniform(ks[8], (hidden_size,), jnp.float32, -4.0, 0.0),
    }


def _reference_forward(x, p):
    """Pure-JAX reference replicating the PyTorch loop (for validation)."""
    B, S, _ = x.shape
    H = p["w1"].shape[1]
    beta1 = jax.nn.sigmoid(p["tau_n1"])
    beta2 = jax.nn.sigmoid(p["tau_n2"])
    alpha = jax.nn.sigmoid(p["tau_m"])

    def step(carry, xt):
        mem, d1, d2 = carry
        d1_in = xt[:, :HALF_IN] @ p["w1"] + p["b1"]
        d2_in = xt[:, HALF_IN:] @ p["w2"] + p["b2"]
        d1 = beta1 * d1 + (1 - beta1) * d1_in
        d2 = beta2 * d2 + (1 - beta2) * d2_in
        mem = alpha * mem + (1 - alpha) * (d1 + d2)
        y = jax.nn.sigmoid(mem @ p["wo"] + p["bo"])
        return (mem, d1, d2), y

    init = (jnp.zeros((B, H)), jnp.zeros((B, H)), jnp.zeros((B, H)))
    _, ys = jax.lax.scan(step, init, jnp.transpose(x, (1, 0, 2)))
    return jnp.transpose(ys, (1, 0, 2))


# TODO(synk): branch1_activities / branch2_activities bookkeeping (detached
# per-step clones for analysis) is not materialized by the kernel.

if __name__ == "__main__":
    key = jax.random.PRNGKey(0)
    pkey, xkey1, xkey2 = jax.random.split(key, 3)
    params = init_params(pkey)

    fwd = jax.jit(dh_sfnn_forward)

    # Case 1: tiny shapes (single batch block, single time block).
    x1 = jax.random.normal(xkey1, (2, 8, INPUT_SIZE), jnp.float32)
    y1 = jax.block_until_ready(fwd(x1, params))
    assert y1.shape == (2, 8, OUT)
    assert jnp.allclose(y1, _reference_forward(x1, params), atol=5e-5, rtol=5e-5), \
        "mismatch vs reference (case 1)"

    # Case 2: exercises batch padding, multi-time-block state carry and
    # time padding (S=160 > t_blk=128).
    x2 = jax.random.normal(xkey2, (18, 160, INPUT_SIZE), jnp.float32)
    y2 = jax.block_until_ready(fwd(x2, params))
    assert y2.shape == (18, 160, OUT)
    assert jnp.allclose(y2, _reference_forward(x2, params), atol=5e-5, rtol=5e-5), \
        "mismatch vs reference (case 2)"

    print("KERNEL_OK")
</pallas_src>

<mosaic_0001>
module attributes {stable_mosaic.version = 11 : i64} {
  func.func @_dh_sfnn_kernel(%arg0: i32, %arg1: i32, %arg2: memref<1x64x40xf32, #tpu.memory_space<vmem>>, %arg3: memref<40x128xf32, #tpu.memory_space<vmem>>, %arg4: memref<8x128xf32, #tpu.memory_space<vmem>>, %arg5: memref<1x1xf32, #tpu.memory_space<vmem>>, %arg6: memref<8x8xf32, #tpu.memory_space<vmem>>, %arg7: memref<64x128xf32, #tpu.memory_space<vmem>>, %arg8: memref<8x128xf32, #tpu.memory_space<vmem>>, %arg9: memref<8x128xf32, #tpu.memory_space<vmem>>) attributes {dimension_semantics = [#tpu.dimension_semantics<parallel>, #tpu.dimension_semantics<arbitrary>], iteration_bounds = array<i64: 1, 1>, scalar_prefetch = 0 : i64, scratch_operands = 3 : i64, tpu.core_type = #tpu.core_type<tc>, window_params = [{transform_indices = @transform_0, window_bounds = array<i64: 1, 64, 40>}, {pipeline_mode = #tpu.pipeline_mode<synchronous>, transform_indices = @transform_1, window_bounds = array<i64: 40, 128>}, {pipeline_mode = #tpu.pipeline_mode<synchronous>, transform_indices = @transform_2, window_bounds = array<i64: 8, 128>}, {pipeline_mode = #tpu.pipeline_mode<synchronous>, transform_indices = @transform_3, window_bounds = array<i64: 1, 1>}, {transform_indices = @transform_4, window_bounds = array<i64: 8, 8>}]} {
    %c0_i32 = arith.constant 0 : i32
    %0 = arith.cmpi eq, %arg1, %c0_i32 : i32
    %1 = arith.extui %0 : i1 to i32
    %c0_i32_0 = arith.constant 0 : i32
    %2 = arith.cmpi ne, %1, %c0_i32_0 : i32
    scf.if %2 {
      %cst_51 = arith.constant 0.000000e+00 : f32
      %179 = vector.broadcast %cst_51 : f32 to vector<8x128xf32>
      %c0_52 = arith.constant 0 : index
      %c0_53 = arith.constant 0 : index
      %180 = vector.load %arg8[%c0_52, %c0_53] : memref<8x128xf32, #tpu.memory_space<vmem>>, vector<8x128xf32>
      tpu.vector_store %arg8[%c0_52, %c0_53], %179 {strides = array<i32>} : memref<8x128xf32, #tpu.memory_space<vmem>>, vector<8x128xf32>,
      %cst_54 = arith.constant 0.000000e+00 : f32
      %181 = vector.broadcast %cst_54 : f32 to vector<8x128xf32>
      %c0_55 = arith.constant 0 : index
      %c0_56 = arith.constant 0 : index
      %182 = vector.load %arg9[%c0_55, %c0_56] : memref<8x128xf32, #tpu.memory_space<vmem>>, vector<8x128xf32>
      tpu.vector_store %arg9[%c0_55, %c0_56], %181 {strides = array<i32>} : memref<8x128xf32, #tpu.memory_space<vmem>>, vector<8x128xf32>,
    } else {
    }
    %c0 = arith.constant 0 : index
    %c0_1 = arith.constant 0 : index
    %c0_2 = arith.constant 0 : index
    %3 = vector.load %arg2[%c0, %c0_1, %c0_2] : memref<1x64x40xf32, #tpu.memory_space<vmem>>, vector<1x64x40xf32>
    %4 = vector.shape_cast %3 : vector<1x64x40xf32> to vector<64x40xf32>
    %c0_3 = arith.constant 0 : index
    %c0_4 = arith.constant 0 : index
    %5 = vector.load %arg3[%c0_3, %c0_4] : memref<40x128xf32, #tpu.memory_space<vmem>>, vector<40x128xf32>
    %cst = arith.constant dense<0.000000e+00> : vector<64x128xf32>
    %6 = tpu.matmul %4, %5, %cst {dimension_numbers = #tpu.dot_dimension_numbers<[1], [0], [0], [1], [0, 0, 1, 1], [], []>} : vector<64x40xf32>, vector<40x128xf32>, vector<64x128xf32> -> vector<64x128xf32>
    %c3 = arith.constant 3 : index
    %c0_5 = arith.constant 0 : index
    %7 = vector.load %arg4[%c3, %c0_5] : memref<8x128xf32, #tpu.memory_space<vmem>>, vector<1x128xf32>
    %8 = vector.broadcast %7 : vector<1x128xf32> to vector<64x128xf32>
    %9 = arith.addf %6, %8 : vector<64x128xf32>
    %c0_6 = arith.constant 0 : index
    %c0_7 = arith.constant 0 : index
    %10 = vector.load %arg7[%c0_6, %c0_7] : memref<64x128xf32, #tpu.memory_space<vmem>>, vector<64x128xf32>
    tpu.vector_store %arg7[%c0_6, %c0_7], %9 {strides = array<i32>} : memref<64x128xf32, #tpu.memory_space<vmem>>, vector<64x128xf32>,
    %c0_8 = arith.constant 0 : index
    %c0_9 = arith.constant 0 : index
    %11 = vector.load %arg4[%c0_8, %c0_9] : memref<8x128xf32, #tpu.memory_space<vmem>>, vector<1x128xf32>
    %12 = vector.shape_cast %11 : vector<1x128xf32> to vector<1x128xf32>
    %13 = vector.broadcast %12 : vector<1x128xf32> to vector<8x128xf32>
    %c1 = arith.constant 1 : index
    %c0_10 = arith.constant 0 : index
    %14 = vector.load %arg4[%c1, %c0_10] : memref<8x128xf32, #tpu.memory_space<vmem>>, vector<1x128xf32>
    %15 = vector.shape_cast %14 : vector<1x128xf32> to vector<1x128xf32>
    %16 = vector.broadcast %15 : vector<1x128xf32> to vector<8x128xf32>
    %c2 = arith.constant 2 : index
    %c0_11 = arith.constant 0 : index
    %17 = vector.load %arg4[%c2, %c0_11] : memref<8x128xf32, #tpu.memory_space<vmem>>, vector<1x128xf32>
    %18 = vector.shape_cast %17 : vector<1x128xf32> to vector<1x128xf32>
    %19 = vector.broadcast %18 : vector<1x128xf32> to vector<8x128xf32>
    %20 = tpu.iota {dimensions = array<i32: 1>} : vector<1x8xi32>
    %cst_12 = arith.constant 0.000000e+00 : f32
    %21 = vector.broadcast %cst_12 : f32 to vector<8x8xf32>
    %c0_13 = arith.constant 0 : index
    %c0_14 = arith.constant 0 : index
    %22 = vector.load %arg8[%c0_13, %c0_14] : memref<8x128xf32, #tpu.memory_space<vmem>>, vector<8x128xf32>
    %c0_15 = arith.constant 0 : index
    %c0_16 = arith.constant 0 : index
    %23 = vector.load %arg9[%c0_15, %c0_16] : memref<8x128xf32, #tpu.memory_space<vmem>>, vector<8x128xf32>
    %c0_i32_17 = arith.constant 0 : i32
    %c8_i32 = arith.constant 8 : i32
    %24 = arith.muli %c0_i32_17, %c8_i32 : i32
    %25 = tpu.assume_multiple %24, 8 : i32
    %26 = arith.index_cast %25 : i32 to index
    %c0_18 = arith.constant 0 : index
    %27 = vector.load %arg7[%26, %c0_18] : memref<64x128xf32, #tpu.memory_space<vmem>>, vector<8x128xf32>
    %28 = arith.mulf %13, %22 : vector<8x128xf32>
    %29 = arith.addf %28, %27 : vector<8x128xf32>
    %30 = arith.mulf %16, %23 : vector<8x128xf32>
    %31 = arith.addf %30, %29 : vector<8x128xf32>
    %32 = arith.mulf %31, %19 : vector<8x128xf32>
    %cst_19 = arith.constant dense<0.000000e+00> : vector<8xf32>
    %33 = vector.multi_reduction <add>, %32, %cst_19 [1] : vector<8x128xf32> to vector<8xf32>
    %34 = vector.shape_cast %33 : vector<8xf32> to vector<8x1xf32>
    %35 = vector.broadcast %c0_i32_17 : i32 to vector<1x8xi32>
    %36 = arith.cmpi eq, %20, %35 : vector<1x8xi32>
    %37 = vector.shape_cast %36 : vector<1x8xi1> to vector<1x8xi1>
    %38 = vector.broadcast %37 : vector<1x8xi1> to vector<8x8xi1>
    %39 = vector.shape_cast %34 : vector<8x1xf32> to vector<8x1xf32>
    %40 = vector.broadcast %39 : vector<8x1xf32> to vector<8x8xf32>
    %41 = arith.select %38, %40, %21 : vector<8x8xi1>, vector<8x8xf32>
    %c1_i32 = arith.constant 1 : i32
    %c8_i32_20 = arith.constant 8 : i32
    %42 = arith.muli %c1_i32, %c8_i32_20 : i32
    %43 = tpu.assume_multiple %42, 8 : i32
    %44 = arith.index_cast %43 : i32 to index
    %c0_21 = arith.constant 0 : index
    %45 = vector.load %arg7[%44, %c0_21] : memref<64x128xf32, #tpu.memory_space<vmem>>, vector<8x128xf32>
    %46 = arith.mulf %13, %29 : vector<8x128xf32>
    %47 = arith.addf %46, %45 : vector<8x128xf32>
    %48 = arith.mulf %16, %31 : vector<8x128xf32>
    %49 = arith.addf %48, %47 : vector<8x128xf32>
    %50 = arith.mulf %49, %19 : vector<8x128xf32>
    %cst_22 = arith.constant dense<0.000000e+00> : vector<8xf32>
    %51 = vector.multi_reduction <add>, %50, %cst_22 [1] : vector<8x128xf32> to vector<8xf32>
    %52 = vector.shape_cast %51 : vector<8xf32> to vector<8x1xf32>
    %53 = vector.broadcast %c1_i32 : i32 to vector<1x8xi32>
    %54 = arith.cmpi eq, %20, %53 : vector<1x8xi32>
    %55 = vector.shape_cast %54 : vector<1x8xi1> to vector<1x8xi1>
    %56 = vector.broadcast %55 : vector<1x8xi1> to vector<8x8xi1>
    %57 = vector.shape_cast %52 : vector<8x1xf32> to vector<8x1xf32>
    %58 = vector.broadcast %57 : vector<8x1xf32> to vector<8x8xf32>
    %59 = arith.select %56, %58, %41 : vector<8x8xi1>, vector<8x8xf32>
    %c2_i32 = arith.constant 2 : i32
    %c8_i32_23 = arith.constant 8 : i32
    %60 = arith.muli %c2_i32, %c8_i32_23 : i32
    %61 = tpu.assume_multiple %60, 8 : i32
    %62 = arith.index_cast %61 : i32 to index
    %c0_24 = arith.constant 0 : index
    %63 = vector.load %arg7[%62, %c0_24] : memref<64x128xf32, #tpu.memory_space<vmem>>, vector<8x128xf32>
    %64 = arith.mulf %13, %47 : vector<8x128xf32>
    %65 = arith.addf %64, %63 : vector<8x128xf32>
    %66 = arith.mulf %16, %49 : vector<8x128xf32>
    %67 = arith.addf %66, %65 : vector<8x128xf32>
    %68 = arith.mulf %67, %19 : vector<8x128xf32>
    %cst_25 = arith.constant dense<0.000000e+00> : vector<8xf32>
    %69 = vector.multi_reduction <add>, %68, %cst_25 [1] : vector<8x128xf32> to vector<8xf32>
    %70 = vector.shape_cast %69 : vector<8xf32> to vector<8x1xf32>
    %71 = vector.broadcast %c2_i32 : i32 to vector<1x8xi32>
    %72 = arith.cmpi eq, %20, %71 : vector<1x8xi32>
    %73 = vector.shape_cast %72 : vector<1x8xi1> to vector<1x8xi1>
    %74 = vector.broadcast %73 : vector<1x8xi1> to vector<8x8xi1>
    %75 = vector.shape_cast %70 : vector<8x1xf32> to vector<8x1xf32>
    %76 = vector.broadcast %75 : vector<8x1xf32> to vector<8x8xf32>
    %77 = arith.select %74, %76, %59 : vector<8x8xi1>, vector<8x8xf32>
    %c3_i32 = arith.constant 3 : i32
    %c8_i32_26 = arith.constant 8 : i32
    %78 = arith.muli %c3_i32, %c8_i32_26 : i32
    %79 = tpu.assume_multiple %78, 8 : i32
    %80 = arith.index_cast %79 : i32 to index
    %c0_27 = arith.constant 0 : index
    %81 = vector.load %arg7[%80, %c0_27] : memref<64x128xf32, #tpu.memory_space<vmem>>, vector<8x128xf32>
    %82 = arith.mulf %13, %65 : vector<8x128xf32>
    %83 = arith.addf %82, %81 : vector<8x128xf32>
    %84 = arith.mulf %16, %67 : vector<8x128xf32>
    %85 = arith.addf %84, %83 : vector<8x128xf32>
    %86 = arith.mulf %85, %19 : vector<8x128xf32>
    %cst_28 = arith.constant dense<0.000000e+00> : vector<8xf32>
    %87 = vector.multi_reduction <add>, %86, %cst_28 [1] : vector<8x128xf32> to vector<8xf32>
    %88 = vector.shape_cast %87 : vector<8xf32> to vector<8x1xf32>
    %89 = vector.broadcast %c3_i32 : i32 to vector<1x8xi32>
    %90 = arith.cmpi eq, %20, %89 : vector<1x8xi32>
    %91 = vector.shape_cast %90 : vector<1x8xi1> to vector<1x8xi1>
    %92 = vector.broadcast %91 : vector<1x8xi1> to vector<8x8xi1>
    %93 = vector.shape_cast %88 : vector<8x1xf32> to vector<8x1xf32>
    %94 = vector.broadcast %93 : vector<8x1xf32> to vector<8x8xf32>
    %95 = arith.select %92, %94, %77 : vector<8x8xi1>, vector<8x8xf32>
    %c4_i32 = arith.constant 4 : i32
    %c8_i32_29 = arith.constant 8 : i32
    %96 = arith.muli %c4_i32, %c8_i32_29 : i32
    %97 = tpu.assume_multiple %96, 8 : i32
    %98 = arith.index_cast %97 : i32 to index
    %c0_30 = arith.constant 0 : index
    %99 = vector.load %arg7[%98, %c0_30] : memref<64x128xf32, #tpu.memory_space<vmem>>, vector<8x128xf32>
    %100 = arith.mulf %13, %83 : vector<8x128xf32>
    %101 = arith.addf %100, %99 : vector<8x128xf32>
    %102 = arith.mulf %16, %85 : vector<8x128xf32>
    %103 = arith.addf %102, %101 : vector<8x128xf32>
    %104 = arith.mulf %103, %19 : vector<8x128xf32>
    %cst_31 = arith.constant dense<0.000000e+00> : vector<8xf32>
    %105 = vector.multi_reduction <add>, %104, %cst_31 [1] : vector<8x128xf32> to vector<8xf32>
    %106 = vector.shape_cast %105 : vector<8xf32> to vector<8x1xf32>
    %107 = vector.broadcast %c4_i32 : i32 to vector<1x8xi32>
    %108 = arith.cmpi eq, %20, %107 : vector<1x8xi32>
    %109 = vector.shape_cast %108 : vector<1x8xi1> to vector<1x8xi1>
    %110 = vector.broadcast %109 : vector<1x8xi1> to vector<8x8xi1>
    %111 = vector.shape_cast %106 : vector<8x1xf32> to vector<8x1xf32>
    %112 = vector.broadcast %111 : vector<8x1xf32> to vector<8x8xf32>
    %113 = arith.select %110, %112, %95 : vector<8x8xi1>, vector<8x8xf32>
    %c5_i32 = arith.constant 5 : i32
    %c8_i32_32 = arith.constant 8 : i32
    %114 = arith.muli %c5_i32, %c8_i32_32 : i32
    %115 = tpu.assume_multiple %114, 8 : i32
    %116 = arith.index_cast %115 : i32 to index
    %c0_33 = arith.constant 0 : index
    %117 = vector.load %arg7[%116, %c0_33] : memref<64x128xf32, #tpu.memory_space<vmem>>, vector<8x128xf32>
    %118 = arith.mulf %13, %101 : vector<8x128xf32>
    %119 = arith.addf %118, %117 : vector<8x128xf32>
    %120 = arith.mulf %16, %103 : vector<8x128xf32>
    %121 = arith.addf %120, %119 : vector<8x128xf32>
    %122 = arith.mulf %121, %19 : vector<8x128xf32>
    %cst_34 = arith.constant dense<0.000000e+00> : vector<8xf32>
    %123 = vector.multi_reduction <add>, %122, %cst_34 [1] : vector<8x128xf32> to vector<8xf32>
    %124 = vector.shape_cast %123 : vector<8xf32> to vector<8x1xf32>
    %125 = vector.broadcast %c5_i32 : i32 to vector<1x8xi32>
    %126 = arith.cmpi eq, %20, %125 : vector<1x8xi32>
    %127 = vector.shape_cast %126 : vector<1x8xi1> to vector<1x8xi1>
    %128 = vector.broadcast %127 : vector<1x8xi1> to vector<8x8xi1>
    %129 = vector.shape_cast %124 : vector<8x1xf32> to vector<8x1xf32>
    %130 = vector.broadcast %129 : vector<8x1xf32> to vector<8x8xf32>
    %131 = arith.select %128, %130, %113 : vector<8x8xi1>, vector<8x8xf32>
    %c6_i32 = arith.constant 6 : i32
    %c8_i32_35 = arith.constant 8 : i32
    %132 = arith.muli %c6_i32, %c8_i32_35 : i32
    %133 = tpu.assume_multiple %132, 8 : i32
    %134 = arith.index_cast %133 : i32 to index
    %c0_36 = arith.constant 0 : index
    %135 = vector.load %arg7[%134, %c0_36] : memref<64x128xf32, #tpu.memory_space<vmem>>, vector<8x128xf32>
    %136 = arith.mulf %13, %119 : vector<8x128xf32>
    %137 = arith.addf %136, %135 : vector<8x128xf32>
    %138 = arith.mulf %16, %121 : vector<8x128xf32>
    %139 = arith.addf %138, %137 : vector<8x128xf32>
    %140 = arith.mulf %139, %19 : vector<8x128xf32>
    %cst_37 = arith.constant dense<0.000000e+00> : vector<8xf32>
    %141 = vector.multi_reduction <add>, %140, %cst_37 [1] : vector<8x128xf32> to vector<8xf32>
    %142 = vector.shape_cast %141 : vector<8xf32> to vector<8x1xf32>
    %143 = vector.broadcast %c6_i32 : i32 to vector<1x8xi32>
    %144 = arith.cmpi eq, %20, %143 : vector<1x8xi32>
    %145 = vector.shape_cast %144 : vector<1x8xi1> to vector<1x8xi1>
    %146 = vector.broadcast %145 : vector<1x8xi1> to vector<8x8xi1>
    %147 = vector.shape_cast %142 : vector<8x1xf32> to vector<8x1xf32>
    %148 = vector.broadcast %147 : vector<8x1xf32> to vector<8x8xf32>
    %149 = arith.select %146, %148, %131 : vector<8x8xi1>, vector<8x8xf32>
    %c7_i32 = arith.constant 7 : i32
    %c8_i32_38 = arith.constant 8 : i32
    %150 = arith.muli %c7_i32, %c8_i32_38 : i32
    %151 = tpu.assume_multiple %150, 8 : i32
    %152 = arith.index_cast %151 : i32 to index
    %c0_39 = arith.constant 0 : index
    %153 = vector.load %arg7[%152, %c0_39] : memref<64x128xf32, #tpu.memory_space<vmem>>, vector<8x128xf32>
    %154 = arith.mulf %13, %137 : vector<8x128xf32>
    %155 = arith.addf %154, %153 : vector<8x128xf32>
    %156 = arith.mulf %16, %139 : vector<8x128xf32>
    %157 = arith.addf %156, %155 : vector<8x128xf32>
    %158 = arith.mulf %157, %19 : vector<8x128xf32>
    %cst_40 = arith.constant dense<0.000000e+00> : vector<8xf32>
    %159 = vector.multi_reduction <add>, %158, %cst_40 [1] : vector<8x128xf32> to vector<8xf32>
    %160 = vector.shape_cast %159 : vector<8xf32> to vector<8x1xf32>
    %161 = vector.broadcast %c7_i32 : i32 to vector<1x8xi32>
    %162 = arith.cmpi eq, %20, %161 : vector<1x8xi32>
    %163 = vector.shape_cast %162 : vector<1x8xi1> to vector<1x8xi1>
    %164 = vector.broadcast %163 : vector<1x8xi1> to vector<8x8xi1>
    %165 = vector.shape_cast %160 : vector<8x1xf32> to vector<8x1xf32>
    %166 = vector.broadcast %165 : vector<8x1xf32> to vector<8x8xf32>
    %167 = arith.select %164, %166, %149 : vector<8x8xi1>, vector<8x8xf32>
    %c8_i32_41 = arith.constant 8 : i32
    %c0_42 = arith.constant 0 : index
    %c0_43 = arith.constant 0 : index
    %168 = vector.load %arg8[%c0_42, %c0_43] : memref<8x128xf32, #tpu.memory_space<vmem>>, vector<8x128xf32>
    tpu.vector_store %arg8[%c0_42, %c0_43], %155 {strides = array<i32>} : memref<8x128xf32, #tpu.memory_space<vmem>>, vector<8x128xf32>,
    %c0_44 = arith.constant 0 : index
    %c0_45 = arith.constant 0 : index
    %169 = vector.load %arg9[%c0_44, %c0_45] : memref<8x128xf32, #tpu.memory_space<vmem>>, vector<8x128xf32>
    tpu.vector_store %arg9[%c0_44, %c0_45], %157 {strides = array<i32>} : memref<8x128xf32, #tpu.memory_space<vmem>>, vector<8x128xf32>,
    %c0_46 = arith.constant 0 : index
    %c0_47 = arith.constant 0 : index
    %170 = vector.load %arg5[%c0_46, %c0_47] : memref<1x1xf32, #tpu.memory_space<vmem>>, vector<1x1xf32>
    %171 = vector.broadcast %170 : vector<1x1xf32> to vector<8x8xf32>
    %172 = arith.addf %167, %171 : vector<8x8xf32>
    %173 = arith.negf %172 : vector<8x8xf32>
    %174 = math.exp %173 : vector<8x8xf32>
    %cst_48 = arith.constant 1.000000e+00 : f32
    %175 = vector.broadcast %cst_48 : f32 to vector<8x8xf32>
    %176 = arith.addf %175, %174 : vector<8x8xf32>
    %177 = arith.divf %175, %176 : vector<8x8xf32>
    %c0_49 = arith.constant 0 : index
    %c0_50 = arith.constant 0 : index
    %178 = vector.load %arg6[%c0_49, %c0_50] : memref<8x8xf32, #tpu.memory_space<vmem>>, vector<8x8xf32>
    tpu.vector_store %arg6[%c0_49, %c0_50], %177 {strides = array<i32>} : memref<8x8xf32, #tpu.memory_space<vmem>>, vector<8x8xf32>,
    return
  }
  func.func @transform_0(%arg0: i32, %arg1: i32) -> (i32, i32, i32) {
    %c0_i32 = arith.constant 0 : i32
    %c0_i32_0 = arith.constant 0 : i32
    return %arg0, %arg1, %c0_i32 : i32, i32, i32
  }
  func.func @transform_1(%arg0: i32, %arg1: i32) -> (i32, i32) {
    %c0_i32 = arith.constant 0 : i32
    %c0_i32_0 = arith.constant 0 : i32
    %c0_i32_1 = arith.constant 0 : i32
    return %c0_i32, %c0_i32_0 : i32, i32
  }
  func.func @transform_2(%arg0: i32, %arg1: i32) -> (i32, i32) {
    %c0_i32 = arith.constant 0 : i32
    %c0_i32_0 = arith.constant 0 : i32
    %c0_i32_1 = arith.constant 0 : i32
    return %c0_i32, %c0_i32_0 : i32, i32
  }
  func.func @transform_3(%arg0: i32, %arg1: i32) -> (i32, i32) {
    %c0_i32 = arith.constant 0 : i32
    %c0_i32_0 = arith.constant 0 : i32
    %c0_i32_1 = arith.constant 0 : i32
    return %c0_i32, %c0_i32_0 : i32, i32
  }
  func.func @transform_4(%arg0: i32, %arg1: i32) -> (i32, i32) {
    %c0_i32 = arith.constant 0 : i32
    return %arg0, %arg1 : i32, i32
  }
}

</mosaic_0001>

<bundles_post_ra>
// kernel: dh_sfnn_forward.1
= control target key start
LH: loop header
LB: loop body
LE: loop exit
PB: predicated region body
PF: predicated region fallthrough
CT: control target
= control target key end

     0   :  { %vm43_vm0 = vcmask 326656   ;;  %v393_v13 = vmov 0   ;;  %vm322_vm9 = vcmask 64512   ;;  %s484_s1 = inlined_call_operand.vmem [shape: f32[40,128], index: 1, kind: input, shape index: {}]   ;;  %s485_s0 = inlined_call_operand.vmem [shape: f32[1,64,40], index: 0, kind: input, shape index: {}]   ;;  %s486_s3 = inlined_call_operand.<no memory space> [shape: f32[1,1], index: 3, kind: input, shape index: {}]   ;;  %s487_s2 = inlined_call_operand.vmem [shape: f32[8,128], index: 2, kind: input, shape index: {}]   ;;  %s488_s4 = inlined_call_operand.vmem [shape: f32[8,8], index: 4, kind: output, shape index: {}]  }
   0x1   :  { %v37_v0 = vld [vmem:[%s484_s1 + $0x20] sm:$0xff]  ;;  %v36_v1 = vld [vmem:[%s484_s1 + $0x18] sm:$0xff]  ;;  %v35_v3 = vld [vmem:[%s484_s1 + $0x10] sm:$0xff]  ;;  %388 = vset.pattern.permute.xlu0 %v393_v13  ;;  %v9_v14 = vstv %s486_s3 }
   0x2   :  { %355 = vmatprep.subr.mxu0 %v37_v0  ;;  %v25_v2 = vld [vmem:[%s485_s0] sm:$0xff]  ;;  %377 = vmatprep.subr.mxu1 %v37_v0  ;;  %v34_v4 = vld [vmem:[%s484_s1 + $0x8] sm:$0xff]  ;;  %v27_v7 = vld [vmem:[%s485_s0 + $0x10] sm:$0xff]  ;;  %10 = vst [vmem:[#allocation5] sm:$0x1] %v9_v14 }
   0x3   :  { %356 = vmatpush3.msra.mxu0 %v37_v0  ;;  %365 = vmatprep.mubr.msk.f32.mxu0 %vm43_vm0, %v25_v2  ;;  %v33_v5 = vld [vmem:[%s484_s1] sm:$0xff]  ;;  %v26_v6 = vld [vmem:[%s485_s0 + $0x8] sm:$0xff]  ;;  %v31_v10 = vld [vmem:[%s485_s0 + $0x30] sm:$0xff] }
   0x4   :  { %357 = vmatprep.subr.mxu0 %v36_v1  ;;  %382 = vmatpush3.msra.mxu1 %v37_v0  ;;  %v29_v8 = vld [vmem:[%s485_s0 + $0x20] sm:$0xff]  ;;  %v30_v9 = vld [vmem:[%s485_s0 + $0x28] sm:$0xff]  ;;  %v28_v11 = vld [vmem:[%s485_s0 + $0x18] sm:$0xff] }
   0x5   :  { %358 = vmatpush3.msra.mxu0 %v36_v1  ;;  %378 = vmatprep.subr.mxu1 %v36_v1  ;;  %v32_v12 = vld [vmem:[%s485_s0 + $0x38] sm:$0xff]  ;;  %v337_v15 = vld [vmem:[%s487_s2] ss:$0 sm:$0xff]  ;;  %v338_v17 = vld [vmem:[%s487_s2 + $0x1] ss:$0 sm:$0xff] }
   0x6   :  { %359 = vmatprep.subr.mxu0 %v35_v3  ;;  %383 = vmatpush3.msra.mxu1 %v36_v1  ;;  %v201_v18 = vmul.f32 0.0, %v337_v15  ;;  %v328_v19 = vld [vmem:[%s487_s2 + $0x3] ss:$0 sm:$0xff]  ;;  %v203_v22 = vmul.f32 0.0, %v338_v17  ;;  %v339_v25 = vld [vmem:[%s487_s2 + $0x2] ss:$0 sm:$0xff] }
   0x7   :  { %360 = vmatpush3.msra.mxu0 %v35_v3  ;;  %379 = vmatprep.subr.mxu1 %v35_v3 }
   0x8   :  { %361 = vmatprep.subr.mxu0 %v34_v4  ;;  %384 = vmatpush3.msra.mxu1 %v35_v3 }
   0x9   :  { %362 = vmatpush3.msra.mxu0 %v34_v4  ;;  %380 = vmatprep.subr.mxu1 %v34_v4 }
   0xa   :  { %363 = vmatprep.subr.mxu0 %v33_v5  ;;  %385 = vmatpush3.msra.mxu1 %v34_v4 }
   0xb   :  { %364 = vmatpush3.msra.mxu0 %v33_v5  ;;  %381 = vmatprep.subr.mxu1 %v33_v5 }
   0xc   :  { %366 = vmatmul.mubr.msk.f32.vlgmr.msra.gmra.mxu0 %vm43_vm0, %v26_v6  ;;  %386 = vmatpush3.msra.mxu1 %v33_v5 }
   0xd   :  { %368 = vmatprep.mubr.msk.f32.mxu0 %vm43_vm0, %v27_v7  ;;  %371 = vmatprep.mubr.msk.f32.mxu1 %vm43_vm0, %v29_v8 }
   0xe   :  { %372 = vmatmul.mubr.msk.f32.vlgmr.msra.gmra.mxu1 %vm43_vm0, %v30_v9 }
   0xf   :  { %374 = vmatprep.mubr.msk.f32.mxu1 %vm43_vm0, %v31_v10 }
  0x10   :  { %369 = vmatmul.mubr.msk.f32.gmra.mxu0 %vm43_vm0, %v28_v11  ;;  %v340_v11 = vld [vmem:[#allocation5] ss:$0 sm:$0xff] }
  0x12   :  { %375 = vmatmul.mubr.msk.f32.gmra.mxu1 %vm43_vm0, %v32_v12  ;;  %v196_v12 = vlaneseq }
  0xcc   :  { %v367_v16 = vpop.f32.mrf.mxu0 }
  0xcd   :  { %v140_v26 = vadd.f32 %v367_v16, %v328_v19  ;;  %v197_v16 = vand.u32 127, %v196_v12 }
  0xce   :  { %v134_v20 = vpop.f32.mrf.mxu0  ;;  %v373_v36 = vpop.f32.mrf.mxu1 }
  0xcf   :  { %v135_v21 = vadd.f32 %v328_v19, %v134_v20  ;;  %v160_v54 = vadd.f32 %v373_v36, %v328_v19  ;;  %vm208_vm1 = vcmp.eq.s32.totalorder %v197_v16, 0  ;;  %vm221_vm2 = vcmp.eq.s32.totalorder %v197_v16, 1 }
  0xd0   :  { %v370_v23 = vpop.f32.mrf.mxu0  ;;  %v154_v43 = vpop.f32.mrf.mxu1  ;;  %vm234_vm3 = vcmp.eq.s32.totalorder %v197_v16, 2  ;;  %vm247_vm4 = vcmp.eq.s32.totalorder %v197_v16, 3  ;;  %vm260_vm5 = vcmp.eq.s32.totalorder %v197_v16, 4  ;;  %vm273_vm6 = vcmp.eq.s32.totalorder %v197_v16, 5 }
  0xd1   :  { %v202_v24 = vadd.f32 %v201_v18, %v135_v21  ;;  %v150_v40 = vadd.f32 %v370_v23, %v328_v19  ;;  %v155_v47 = vadd.f32 %v328_v19, %v154_v43  ;;  %vm286_vm7 = vcmp.eq.s32.totalorder %v197_v16, 6 }
  0xd2   :  { %v144_v29 = vpop.f32.mrf.mxu0  ;;  %v376_v50 = vpop.f32.mrf.mxu1  ;;  %vm299_vm8 = vcmp.eq.s32.totalorder %v197_v16, 7 }
  0xd3   :  { %v214_v27 = vmul.f32 %v337_v15, %v202_v24  ;;  %v204_v28 = vadd.f32 %v203_v22, %v202_v24  ;;  %v145_v33 = vadd.f32 %v328_v19, %v144_v29  ;;  %v170_v3 = vadd.f32 %v376_v50, %v328_v19 }
  0xd4   :  { %v164_v57 = vpop.f32.mrf.mxu1 }
  0xd5   :  { %v215_v30 = vadd.f32 %v214_v27, %v140_v26  ;;  %v205_v31 = vmul.f32 %v339_v25, %v204_v28  ;;  %v216_v32 = vmul.f32 %v338_v17, %v204_v28  ;;  %v165_v61 = vadd.f32 %v328_v19, %v164_v57 }
  0xd7   :  { %v227_v34 = vmul.f32 %v337_v15, %v215_v30  ;;  %206 = vadd.xlane.f32.xlu0 %v205_v31  ;;  %v217_v35 = vadd.f32 %v216_v32, %v215_v30 }
  0xd9   :  { %v228_v37 = vadd.f32 %v227_v34, %v145_v33  ;;  %v218_v38 = vmul.f32 %v339_v25, %v217_v35  ;;  %v229_v39 = vmul.f32 %v338_v17, %v217_v35 }
  0xdb   :  { %v240_v41 = vmul.f32 %v337_v15, %v228_v37  ;;  %219 = vadd.xlane.f32.xlu0 %v218_v38  ;;  %v230_v42 = vadd.f32 %v229_v39, %v228_v37 }
  0xdd   :  { %v241_v44 = vadd.f32 %v240_v41, %v150_v40  ;;  %v231_v45 = vmul.f32 %v339_v25, %v230_v42  ;;  %v242_v46 = vmul.f32 %v338_v17, %v230_v42 }
  0xdf   :  { %v253_v48 = vmul.f32 %v337_v15, %v241_v44  ;;  %232 = vadd.xlane.f32.xlu1 %v231_v45  ;;  %v243_v49 = vadd.f32 %v242_v46, %v241_v44 }
  0xe1   :  { %v254_v51 = vadd.f32 %v253_v48, %v155_v47  ;;  %v244_v52 = vmul.f32 %v339_v25, %v243_v49  ;;  %v255_v53 = vmul.f32 %v338_v17, %v243_v49 }
  0xe3   :  { %v266_v55 = vmul.f32 %v337_v15, %v254_v51  ;;  %245 = vadd.xlane.f32.xlu1 %v244_v52  ;;  %v256_v56 = vadd.f32 %v255_v53, %v254_v51 }
  0xe5   :  { %v267_v58 = vadd.f32 %v266_v55, %v160_v54  ;;  %v257_v59 = vmul.f32 %v339_v25, %v256_v56  ;;  %v268_v60 = vmul.f32 %v338_v17, %v256_v56 }
  0xe7   :  { %v279_v62 = vmul.f32 %v337_v15, %v267_v58  ;;  %258 = vadd.xlane.f32.xlu0 %v257_v59  ;;  %v269_v63 = vadd.f32 %v268_v60, %v267_v58 }
  0xe9   :  { %v280_v0 = vadd.f32 %v279_v62, %v165_v61  ;;  %v270_v1 = vmul.f32 %v339_v25, %v269_v63  ;;  %v281_v2 = vmul.f32 %v338_v17, %v269_v63 }
  0xeb   :  { %v292_v4 = vmul.f32 %v337_v15, %v280_v0  ;;  %271 = vadd.xlane.f32.xlu1 %v270_v1  ;;  %v282_v5 = vadd.f32 %v281_v2, %v280_v0 }
  0xed   :  { %v283_v6 = vmul.f32 %v339_v25, %v282_v5  ;;  %v293_v7 = vadd.f32 %v292_v4, %v170_v3  ;;  %v294_v8 = vmul.f32 %v338_v17, %v282_v5 }
  0xef   :  { %284 = vadd.xlane.f32.xlu0 %v283_v6  ;;  %v295_v9 = vadd.f32 %v294_v8, %v293_v7 }
  0xf1   :  { %v296_v10 = vmul.f32 %v339_v25, %v295_v9 }
  0xf3   :  { %297 = vadd.xlane.f32.xlu1 %v296_v10 }
 0x105   :  { %312 = vperm.xlu0 %388, %v340_v11  }
 0x160   :  { %v207_v13 = vpop.xlane.xlu0 %206 }
 0x161   :  { %v211_v19 = vsel %vm208_vm1, %v207_v13, 0.0 }
 0x164   :  { %v220_v18 = vpop.xlane.xlu0 %219 }
 0x165   :  { %v224_v17 = vsel %vm221_vm2, %v220_v18, %v211_v19 }
 0x168   :  { %v233_v14 = vpop.xlane.xlu1 %232 }
 0x169   :  { %v237_v22 = vsel %vm234_vm3, %v233_v14, %v224_v17 }
 0x16c   :  { %v246_v20 = vpop.xlane.xlu1 %245 }
 0x16d   :  { %v250_v23 = vsel %vm247_vm4, %v246_v20, %v237_v22 }
 0x170   :  { %v259_v15 = vpop.xlane.xlu0 %258 }
 0x171   :  { %v263_v25 = vsel %vm260_vm5, %v259_v15, %v250_v23 }
 0x174   :  { %v272_v21 = vpop.xlane.xlu1 %271 }
 0x175   :  { %v276_v27 = vsel %vm273_vm6, %v272_v21, %v263_v25 }
 0x178   :  { %v285_v24 = vpop.xlane.xlu0 %284 }
 0x179   :  { %v289_v28 = vsel %vm286_vm7, %v285_v24, %v276_v27 }
 0x17c   :  { %v298_v26 = vpop.xlane.xlu1 %297 }
 0x17d   :  { %v302_v29 = vsel %vm299_vm8, %v298_v26, %v289_v28 }
 0x180   :  { %v313_v30 = vpop.permute.xlu0 %312 }
 0x181   :  { %v315_v31 = vadd.f32 %v313_v30, %v302_v29 }
 0x183   :  { %v341_v32 = vmul.f32 -1.442695, %v315_v31 }
 0x185   :  { %389 = vpow2.f32 %v341_v32 }
 0x192   :  { %v390_v33 = vpop.eup %389 }
 0x193   :  { %v319_v34 = vadd.f32 1.0, %v390_v33 }
 0x195   :  { %391 = vrcp.f32 %v319_v34 }
 0x1a2   :  { %v392_v35 = vpop.eup %391 }
 0x1a3   :  { %323 = vst.msk [vmem:[%s488_s4] sm:$0xff] %vm322_vm9, %v392_v35 }

</bundles_post_ra>
